<compile_context>
chip_gen: v5e
topology: v5e:2x2
jax: 0.10.0
libtpu: 0.0.40
codegen_flags: <defaults>
</compile_context>

<pallas_src>
import functools

import jax
import jax.numpy as jnp
from jax.experimental import pallas as pl
from jax.experimental.pallas import tpu as pltpu


def _conv1xk_kernel(x_ref, w_ref, b_ref, o_ref, *, kt, p_valid):
    # x_ref: (1, c_in, P)        one batch row, node/time positions flattened on lanes
    # w_ref: (Kt, c_out, c_in)   per-tap weight matrices
    # b_ref: (c_out, 1)          bias (f32)
    # o_ref: (1, c_out, P_valid) lane-dense output block
    x = x_ref[0]  # (c_in, P), loaded once into the VMEM-resident tile
    acc = jnp.dot(w_ref[0], x[:, 0:p_valid],
                  preferred_element_type=jnp.float32)
    for k in range(1, kt):  # static unroll over the Kt taps
        acc = acc + jnp.dot(w_ref[k], x[:, k:k + p_valid],
                            preferred_element_type=jnp.float32)
    o_ref[0] = (acc + b_ref[...]).astype(o_ref.dtype)


def linear_time_forward(x_nchw, weight, bias, *, compute_dtype=None):
    """Equivalent of torch.nn.Conv2d(c_in, c_out, kernel_size=(1, Kt), bias=True)(x).

    x_nchw: (B, c_in, H, W)
    weight: (c_out, c_in, 1, Kt)   (PyTorch layout)
    bias:   (c_out,)
    returns (B, c_out, H, W - Kt + 1)
    """
    b, c_in, h, w = x_nchw.shape
    c_out, c_in_w, kh, kt = weight.shape
    assert c_in_w == c_in and kh == 1
    w_out = w - kt + 1
    p = h * w
    p_valid = p - kt + 1  # covers every valid position q = h*W + t with t < W_out

    out_dtype = x_nchw.dtype

    # ---- layout plumbing (no data duplication) ----
    x3 = x_nchw.reshape(b, c_in, p)                      # free reshape (merges H, W)
    w_t = jnp.transpose(weight[:, :, 0, :], (2, 0, 1))   # (Kt, c_out, c_in), tiny
    bias2d = bias.reshape(c_out, 1).astype(jnp.float32)  # f32 epilogue

    if compute_dtype is not None:  # e.g. jnp.bfloat16 on v6e/v7x
        x3 = x3.astype(compute_dtype)
        w_t = w_t.astype(compute_dtype)

    kernel = functools.partial(_conv1xk_kernel, kt=kt, p_valid=p_valid)

    out3 = pl.pallas_call(
        kernel,
        out_shape=jax.ShapeDtypeStruct((b, c_out, p_valid), out_dtype),
        grid_spec=pltpu.PrefetchScalarGridSpec(
            num_scalar_prefetch=0,
            grid=(b,),
            in_specs=[
                pl.BlockSpec((1, c_in, p), lambda i: (i, 0, 0)),
                pl.BlockSpec((kt, c_out, c_in), lambda i: (0, 0, 0)),
                pl.BlockSpec((c_out, 1), lambda i: (0, 0)),
            ],
            out_specs=pl.BlockSpec((1, c_out, p_valid), lambda i: (i, 0, 0)),
        ),
        compiler_params=pltpu.CompilerParams(
            dimension_semantics=("parallel",)),
    )(x3, w_t, bias2d)

    # Drop the invalid time columns of each node row: pad back to H*W columns
    # (output-sized, cheap), reshape, slice t < W_out, giving NCHW directly.
    out_full = jnp.pad(out3, ((0, 0), (0, 0), (0, kt - 1)))
    out = out_full.reshape(b, c_out, h, w)[:, :, :, :w_out]
    return out


if __name__ == "__main__":
    # small shapes: B=2, c_in=4, c_out=8, H=16 nodes, W=16 time steps, Kt=3
    B, C_IN, C_OUT, H, W, KT = 2, 4, 8, 16, 16, 3

    key = jax.random.PRNGKey(0)
    kx, kw, kb = jax.random.split(key, 3)

    x = jax.random.normal(kx, (B, C_IN, H, W), dtype=jnp.float32)
    # deterministic synthetic parameters (same shapes as PyTorch Conv2d)
    fan_in = C_IN * 1 * KT
    bound = 1.0 / jnp.sqrt(fan_in)
    weight = jax.random.uniform(kw, (C_OUT, C_IN, 1, KT),
                                minval=-bound, maxval=bound, dtype=jnp.float32)
    bias = jax.random.uniform(kb, (C_OUT,),
                              minval=-bound, maxval=bound, dtype=jnp.float32)

    out = jax.jit(linear_time_forward)(x, weight, bias)
    out = jax.block_until_ready(out)

    # sanity check against pure-JAX conv reference
    ref = jax.lax.conv_general_dilated(
        x, weight, window_strides=(1, 1), padding="VALID",
        dimension_numbers=("NCHW", "OIHW", "NCHW")) + bias.reshape(1, C_OUT, 1, 1)
    assert out.shape == (B, C_OUT, H, W - KT + 1)
    assert jnp.allclose(out, ref, atol=1e-4, rtol=1e-4)

    print("KERNEL_OK")
</pallas_src>

<mosaic_0001>
module attributes {stable_mosaic.version = 11 : i64} {
  func.func @_conv1xk_kernel(%arg0: i32, %arg1: memref<1x4x256xf32, #tpu.memory_space<vmem>>, %arg2: memref<3x8x4xf32, #tpu.memory_space<vmem>>, %arg3: memref<8x1xf32, #tpu.memory_space<vmem>>, %arg4: memref<1x8x254xf32, #tpu.memory_space<vmem>>) attributes {dimension_semantics = [#tpu.dimension_semantics<parallel>], iteration_bounds = array<i64: 2>, scalar_prefetch = 0 : i64, scratch_operands = 0 : i64, tpu.core_type = #tpu.core_type<tc>, window_params = [{transform_indices = @transform_0, window_bounds = array<i64: 1, 4, 256>}, {pipeline_mode = #tpu.pipeline_mode<synchronous>, transform_indices = @transform_1, window_bounds = array<i64: 3, 8, 4>}, {pipeline_mode = #tpu.pipeline_mode<synchronous>, transform_indices = @transform_2, window_bounds = array<i64: 8, 1>}, {transform_indices = @transform_3, window_bounds = array<i64: 1, 8, 254>}]} {
    %c0 = arith.constant 0 : index
    %c0_0 = arith.constant 0 : index
    %c0_1 = arith.constant 0 : index
    %0 = vector.load %arg1[%c0, %c0_0, %c0_1] : memref<1x4x256xf32, #tpu.memory_space<vmem>>, vector<1x4x256xf32>
    %1 = vector.shape_cast %0 : vector<1x4x256xf32> to vector<4x256xf32>
    %c0_2 = arith.constant 0 : index
    %c0_3 = arith.constant 0 : index
    %c0_4 = arith.constant 0 : index
    %2 = vector.load %arg2[%c0_2, %c0_3, %c0_4] : memref<3x8x4xf32, #tpu.memory_space<vmem>>, vector<1x8x4xf32>
    %3 = vector.shape_cast %2 : vector<1x8x4xf32> to vector<8x4xf32>
    %4 = vector.extract_strided_slice %1 {offsets = [0, 0], sizes = [4, 254], strides = [1, 1]} : vector<4x256xf32> to vector<4x254xf32>
    %cst = arith.constant dense<0.000000e+00> : vector<8x254xf32>
    %5 = tpu.matmul %3, %4, %cst {dimension_numbers = #tpu.dot_dimension_numbers<[1], [0], [0], [1], [0, 0, 1, 1], [], []>} : vector<8x4xf32>, vector<4x254xf32>, vector<8x254xf32> -> vector<8x254xf32>
    %c1 = arith.constant 1 : index
    %c0_5 = arith.constant 0 : index
    %c0_6 = arith.constant 0 : index
    %6 = vector.load %arg2[%c1, %c0_5, %c0_6] : memref<3x8x4xf32, #tpu.memory_space<vmem>>, vector<1x8x4xf32>
    %7 = vector.shape_cast %6 : vector<1x8x4xf32> to vector<8x4xf32>
    %8 = vector.extract_strided_slice %1 {offsets = [0, 1], sizes = [4, 254], strides = [1, 1]} : vector<4x256xf32> to vector<4x254xf32>
    %cst_7 = arith.constant dense<0.000000e+00> : vector<8x254xf32>
    %9 = tpu.matmul %7, %8, %cst_7 {dimension_numbers = #tpu.dot_dimension_numbers<[1], [0], [0], [1], [0, 0, 1, 1], [], []>} : vector<8x4xf32>, vector<4x254xf32>, vector<8x254xf32> -> vector<8x254xf32>
    %10 = arith.addf %5, %9 : vector<8x254xf32>
    %c2 = arith.constant 2 : index
    %c0_8 = arith.constant 0 : index
    %c0_9 = arith.constant 0 : index
    %11 = vector.load %arg2[%c2, %c0_8, %c0_9] : memref<3x8x4xf32, #tpu.memory_space<vmem>>, vector<1x8x4xf32>
    %12 = vector.shape_cast %11 : vector<1x8x4xf32> to vector<8x4xf32>
    %13 = vector.extract_strided_slice %1 {offsets = [0, 2], sizes = [4, 254], strides = [1, 1]} : vector<4x256xf32> to vector<4x254xf32>
    %cst_10 = arith.constant dense<0.000000e+00> : vector<8x254xf32>
    %14 = tpu.matmul %12, %13, %cst_10 {dimension_numbers = #tpu.dot_dimension_numbers<[1], [0], [0], [1], [0, 0, 1, 1], [], []>} : vector<8x4xf32>, vector<4x254xf32>, vector<8x254xf32> -> vector<8x254xf32>
    %15 = arith.addf %10, %14 : vector<8x254xf32>
    %c0_11 = arith.constant 0 : index
    %c0_12 = arith.constant 0 : index
    %16 = vector.load %arg3[%c0_11, %c0_12] : memref<8x1xf32, #tpu.memory_space<vmem>>, vector<8x1xf32>
    %17 = vector.broadcast %16 : vector<8x1xf32> to vector<8x254xf32>
    %18 = arith.addf %15, %17 : vector<8x254xf32>
    %c0_13 = arith.constant 0 : index
    %c0_14 = arith.constant 0 : index
    %c0_15 = arith.constant 0 : index
    %19 = vector.load %arg4[%c0_13, %c0_14, %c0_15] : memref<1x8x254xf32, #tpu.memory_space<vmem>>, vector<1x8x254xf32>
    %20 = vector.shape_cast %19 : vector<1x8x254xf32> to vector<8x254xf32>
    %21 = vector.shape_cast %18 : vector<8x254xf32> to vector<1x8x254xf32>
    tpu.vector_store %arg4[%c0_13, %c0_14, %c0_15], %21 {strides = array<i32>} : memref<1x8x254xf32, #tpu.memory_space<vmem>>, vector<1x8x254xf32>,
    return
  }
  func.func @transform_0(%arg0: i32) -> (i32, i32, i32) {
    %c0_i32 = arith.constant 0 : i32
    %c0_i32_0 = arith.constant 0 : i32
    %c0_i32_1 = arith.constant 0 : i32
    return %arg0, %c0_i32, %c0_i32_0 : i32, i32, i32
  }
  func.func @transform_1(%arg0: i32) -> (i32, i32, i32) {
    %c0_i32 = arith.constant 0 : i32
    %c0_i32_0 = arith.constant 0 : i32
    %c0_i32_1 = arith.constant 0 : i32
    %c0_i32_2 = arith.constant 0 : i32
    return %c0_i32, %c0_i32_0, %c0_i32_1 : i32, i32, i32
  }
  func.func @transform_2(%arg0: i32) -> (i32, i32) {
    %c0_i32 = arith.constant 0 : i32
    %c0_i32_0 = arith.constant 0 : i32
    %c0_i32_1 = arith.constant 0 : i32
    return %c0_i32, %c0_i32_0 : i32, i32
  }
  func.func @transform_3(%arg0: i32) -> (i32, i32, i32) {
    %c0_i32 = arith.constant 0 : i32
    %c0_i32_0 = arith.constant 0 : i32
    %c0_i32_1 = arith.constant 0 : i32
    return %arg0, %c0_i32, %c0_i32_0 : i32, i32, i32
  }
}

</mosaic_0001>

<bundles_post_ra>
// kernel: linear_time_forward.1
= control target key start
LH: loop header
LB: loop body
LE: loop exit
PB: predicated region body
PF: predicated region fallthrough
CT: control target
= control target key end

     0   :  { %s480_s12 = smov 0   ;;  %s527_s0 = inlined_call_operand.vmem [shape: f32[2,4,256], index: 0, kind: input, shape index: {}]   ;;  %s528_s1 = inlined_call_operand.vmem [shape: f32[3,8,4], index: 1, kind: input, shape index: {}]   ;;  %s529_s2 = inlined_call_operand.vmem [shape: f32[8,1], index: 2, kind: input, shape index: {}]   ;;  %s530_s3 = inlined_call_operand.vmem [shape: f32[2,8,254], index: 3, kind: output, shape index: {}]  }
   0x1 LB: > { %s409_s13 = sadd.s32 4294967295, %s455_s12   ;;  %p413_p0 = scmp.ge.s32.totalorder %s455_s12, 1  ;;  %s455_s12 = sphi %s480_s12, %s13_s12  }
   0x2   : > { %p137_p1 = scmp.lt.s32.totalorder %s455_s12, 3 }
   0x4   : > { %p138_p2 = pnand %p413_p0, %p137_p1 }
   0x5   : > { %p161_p3 = scmp.lt.s32.totalorder (!%p138_p2), %s409_s13, 1  ;;  %s457_s18 = smov (!%p138_p2), 127  }
   0x6   : > { %141 = sbr.rel (%p138_p2) target bundleno = 295 (0x127), region = 32  ;;  %s458_s19 = smov (!%p138_p2), 126  }
   0xb   : > { %s532_s13 = smov (!%p161_p3, %s409_s13), 1  ;;  %vm189_vm0 = vcmask 1043456   ;;  %vm185_vm1 = vcmask 31744   ;;  %v172_v7 = vld [vmem:[%s528_s1] sm:$0xff]  ;;  %v459_v9 = vmov 0   ;;  %vm183_vm2 = vcmask 1039360  }
   0xc   : > { %s434_s14 = sshll.u32 %s532_s13, 3  ;;  %v344_v8 = vld [vmem:[%s529_s2] sm:$0xff]  ;;  %447 = vset.pattern.permute.xlu2 %v459_v9  ;;  %448 = vset.pattern.permute.xlu0 %v459_v9  ;;  %v418_v11 = vld [vmem:[%s528_s1 + $0x8] sm:$0xff]  ;;  %vm293_vm3 = vcmask 1031168   ;;  %v427_v15 = vld [vmem:[%s528_s1 + $0x10] sm:$0xff]  ;;  %s435_s28 = sshll.u32 %s532_s13, 4 }
   0xd   : > { %s165_s17 = scalar_lea.vmem %s527_s0, %s434_s14  ;;  %347 = vperm.xlu2 %447, %v344_v8   ;;  %s170_s4 = scalar_lea.vmem %s530_s3, %s435_s28 }
   0xe   : > { %v171_v0 = vld [vmem:[%s165_s17] sm:$0xff] }
   0xf   : > { %176 = vst [vmem:[#allocation1] ss:$2 sm:$0xff] %v171_v0 }
  0x16   : > { %v177_v1 = vld.sshfl [vmem:[#allocation1] sm:$0xff pattern:$0x75316420]  ;;  %v178_v2 = vld.sshfl [vmem:[#allocation1 + $0x8] sm:$0xff pattern:$0x75316420] }
  0x17   : > { %179 = vrot.lane.b32.xlu0 %v177_v1, %s457_s18  ;;  %234 = vst [vmem:[#allocation1] ss:$2 sm:$0xff] %v171_v0 }
  0x1e   : > { %v235_v3 = vld.sshfl [vmem:[#allocation1] sm:$0xff pattern:$0x75316420]  ;;  %v236_v4 = vld.sshfl [vmem:[#allocation1 + $0x8] sm:$0xff pattern:$0x75316420] }
  0x1f   : > { %181 = vrot.lane.b32.xlu0 %v178_v2, %s457_s18  ;;  %286 = vst [vmem:[#allocation1] ss:$2 sm:$0xff] %v171_v0  ;;  %423 = vmatpush.msk.msra.mxu2 %vm189_vm0, %v235_v3 }
  0x20   : > { %425 = vmatpush.msk.msra.mxu3 %vm189_vm0, %v236_v4  ;;  %424 = vmatmul.msk.f32.vlgmr.msra.gmra.mxu2 %vm185_vm1, %v172_v7 }
  0x21   : > { %426 = vmatmul.msk.f32.vlgmr.msra.gmra.mxu3 %vm185_vm1, %v172_v7 }
  0x26   : > { %v287_v5 = vld.sshfl [vmem:[#allocation1] sm:$0xff pattern:$0x75316420]  ;;  %v288_v6 = vld.sshfl [vmem:[#allocation1 + $0x8] sm:$0xff pattern:$0x75316420] }
  0x27   : > { %289 = vrot.lane.b32.xlu1 %v287_v5, %s458_s19 }
  0x2f   : > { %291 = vrot.lane.b32.xlu1 %v288_v6, %s458_s19 }
  0x67   : > { %v348_v25 = vpop.permute.xlu2 %347 }
  0x89   : > { %v180_v10 = vpop.permute.xlu0 %179 }
  0x91   : > { %v182_v12 = vpop.permute.xlu0 %181 }
  0x92   : > { %v184_v13 = vsel %vm183_vm2, %v180_v10, %v182_v12  ;;  %421 = vmatpush.msk.msra.mxu1 %vm189_vm0, %v182_v12 }
  0x93   : > { %419 = vmatpush.msk.msra.mxu0 %vm189_vm0, %v184_v13  ;;  %422 = vmatmul.msk.f32.vlgmr.msra.gmra.mxu1 %vm185_vm1, %v418_v11 }
  0x94   : > { %420 = vmatmul.msk.f32.vlgmr.msra.gmra.mxu0 %vm185_vm1, %v418_v11 }
  0x99   : > { %v290_v14 = vpop.permute.xlu1 %289 }
  0xa1   : > { %v292_v16 = vpop.permute.xlu1 %291 }
  0xa2   : > { %430 = vmatpush.msk.msrb.mxu1 %vm189_vm0, %v292_v16  ;;  %v294_v17 = vsel %vm293_vm3, %v290_v14, %v292_v16 }
  0xa3   : > { %428 = vmatpush.msk.msrb.mxu0 %vm189_vm0, %v294_v17  ;;  %431 = vmatmul.msk.f32.vlgmr.msrb.gmra.mxu1 %vm185_vm1, %v427_v15  ;;  %v261_v21 = vpop.f32.mrf.mxu2 }
  0xa4   : > { %429 = vmatmul.msk.f32.vlgmr.msrb.gmra.mxu0 %vm185_vm1, %v427_v15  ;;  %v281_v20 = vpop.f32.mrf.mxu3 }
 0x110   : > { %v231_v18 = vpop.f32.mrf.mxu1 }
 0x111   : > { %v211_v19 = vpop.f32.mrf.mxu0  ;;  %v282_v22 = vadd.f32 %v281_v20, %v231_v18 }
 0x112   : > { %v262_v23 = vadd.f32 %v261_v21, %v211_v19 }
 0x120   : > { %v339_v24 = vpop.f32.mrf.mxu1 }
 0x121   : > { %v319_v26 = vpop.f32.mrf.mxu0  ;;  %v343_v27 = vadd.f32 %v339_v24, %v282_v22 }
 0x122   : > { %v342_v28 = vadd.f32 %v319_v26, %v262_v23 }
 0x123   : > { %v351_v29 = vadd.f32 %v348_v25, %v343_v27 }
 0x124   : > { %v350_v30 = vadd.f32 %v348_v25, %v342_v28 }
 0x125   : > { %353 = vst.msk [vmem:[%s170_s4 + $0x8] sm:$0xff] %vm293_vm3, %v351_v29 }
 0x126   : > { %352 = vst [vmem:[%s170_s4] sm:$0xff] %v350_v30 }
 0x127 PF: > { %s13_s12 = sadd.s32 1, %s455_s12  }
 0x128   : > { %p10_p4 = scmp.ge.s32.totalorder %s13_s12, 4  }
 0x12a   :  { %12 = sbr.rel (!%p10_p4) target bundleno = 1 (0x1), region = 64 }

</bundles_post_ra>
